<compile_context>
chip_gen: v5e
topology: v5e:2x2
jax: 0.10.0
libtpu: 0.0.40
codegen_flags: <defaults>
</compile_context>

<pallas_src>
import numpy as np
import jax
import jax.numpy as jnp
from jax import lax
from jax.experimental import pallas as pl
from jax.experimental.pallas import tpu as pltpu


# ----------------------------------------------------------------------------
# Pallas kernel: fused bidirectional LSTM (single layer) with length masking.
# ----------------------------------------------------------------------------
def bilstm_fused_kernel(src_ref, len_ref, wih_ref, whh_ref, b_ref,
                        out_ref, hn_ref, cn_ref):
    """Fused bi-LSTM.

    src_ref : (T*B, 2E) bf16   row block s = [src[s] | src[T-1-s]]
    len_ref : (B, 1)    int32  sequence lengths
    wih_ref : (2E, 8H)  bf16   block-structured input weights,
                               columns = [i_f i_b | f_f f_b | o_f o_b | g_f g_b]
    whh_ref : (2H, 8H)  bf16   block-diagonal recurrent weights (rows [h_f | h_b])
    b_ref   : (1, 8H)   f32    combined biases (b_ih + b_hh), same column layout
    out_ref : (T, B, 2H) f32   memory bank: fwd half [..., :H], bwd half [..., H:]
    hn_ref  : (B, 2H)   f32    final hidden state [h_fwd | h_bwd]
    cn_ref  : (B, 2H)   f32    final cell state   [c_fwd | c_bwd]
    """
    T, B, two_h = out_ref.shape
    H = two_h // 2

    lens = len_ref[...]                           # (B, 1) int32
    wih = wih_ref[...]                            # (2E, 8H) bf16
    whh = whh_ref[...]                            # (2H, 8H) bf16
    bias = b_ref[...]                             # (1, 8H)  f32

    # ---- hoisted input projection: one lane-dense MXU matmul for all (t, dir) ----
    xp = jnp.dot(src_ref[...], wih, preferred_element_type=jnp.float32) + bias  # (T*B, 8H)

    # ---- boolean length masks, precomputed once ----
    # loop iter s: fwd lanes (pos < H in each 2H block) are time s, bwd lanes time T-1-s
    t_idx = lax.broadcasted_iota(jnp.int32, (T, B, two_h), 0)
    l_idx = lax.broadcasted_iota(jnp.int32, (T, B, two_h), 2)
    t_eff = jnp.where(l_idx < H, t_idx, T - 1 - t_idx)
    mask = lens[None, :, :] > t_eff               # (T, B, 2H) bool

    def sigmoid(x):
        # exp on EUP, approx reciprocal on EUP -> no exact-divide Newton iterations
        return pl.reciprocal(1.0 + jnp.exp(-x), approx=True)

    # h/c carried as values (vregs), fwd in [:, :H], bwd in [:, H:]
    h_cat = jnp.zeros((B, two_h), jnp.float32)
    c_cat = jnp.zeros((B, two_h), jnp.float32)
    fwd_outs = []
    bwd_outs = []

    # fully unrolled fused recurrence (T is a small compile-time constant)
    for s in range(T):
        # row block s of xp already carries fwd@s and bwd@(T-1-s) contributions
        x_s = xp[s * B:(s + 1) * B, :]                                     # (B, 8H)
        gates = x_s + jnp.dot(h_cat.astype(jnp.bfloat16), whh,
                              preferred_element_type=jnp.float32)          # (B, 8H)

        sig = sigmoid(gates[:, 0:3 * two_h])      # one sigmoid over [i | f | o]
        i = sig[:, 0 * two_h:1 * two_h]
        f = sig[:, 1 * two_h:2 * two_h]
        o = sig[:, 2 * two_h:3 * two_h]
        g = jnp.tanh(gates[:, 3 * two_h:4 * two_h])

        c_new = f * c_cat + i * g
        h_new = o * jnp.tanh(c_new)

        m = mask[s]                               # (B, 2H) bool
        out_m = jnp.where(m, h_new, 0.0)          # zero output past sequence end
        h_cat = jnp.where(m, h_new, h_cat)        # freeze state past length
        c_cat = jnp.where(m, c_new, c_cat)

        fwd_outs.append(out_m[:, 0:H])            # forward output at time s
        bwd_outs.append(out_m[:, H:two_h])        # backward output at time T-1-s

    # ---- dense end-of-kernel writes (no per-step masked stores) ----
    out_ref[:, :, 0:H] = jnp.stack(fwd_outs, axis=0)            # (T, B, H)
    out_ref[:, :, H:two_h] = jnp.stack(bwd_outs[::-1], axis=0)  # time-reversed at trace time
    hn_ref[...] = h_cat
    cn_ref[...] = c_cat


# ----------------------------------------------------------------------------
# Wrapper (glue): parameter packing into the fused layout + pallas_call.
# ----------------------------------------------------------------------------
def _fuse_params(params, E, H):
    """Pack per-direction LSTM params into the fused kernel layout.

    Column layout (width 8H): [i_f i_b | f_f f_b | o_f o_b | g_f g_b].
    """
    perm = jnp.array([0, 1, 3, 2], dtype=jnp.int32)   # [i, f, g, o] -> [i, f, o, g]

    def reorder(w, rows):
        return jnp.take(w.reshape(rows, 4, H), perm, axis=1)   # (rows, 4, H)

    wih_f = reorder(params["wih_f"], E)
    wih_b = reorder(params["wih_b"], E)
    whh_f = reorder(params["whh_f"], H)
    whh_b = reorder(params["whh_b"], H)

    zE = jnp.zeros_like(wih_f)
    zH = jnp.zeros_like(whh_f)
    # rows [0:E] feed only fwd gate columns, rows [E:2E] only bwd gate columns
    wih2 = jnp.concatenate(
        [jnp.concatenate([wih_f, zE], axis=2).reshape(E, 8 * H),
         jnp.concatenate([zE, wih_b], axis=2).reshape(E, 8 * H)], axis=0)   # (2E, 8H)
    # block-diagonal recurrent weights: rows [h_f | h_b]
    whh2 = jnp.concatenate(
        [jnp.concatenate([whh_f, zH], axis=2).reshape(H, 8 * H),
         jnp.concatenate([zH, whh_b], axis=2).reshape(H, 8 * H)], axis=0)   # (2H, 8H)

    b_f = jnp.take((params["b_ih_f"] + params["b_hh_f"]).reshape(4, H), perm, axis=0)
    b_b = jnp.take((params["b_ih_b"] + params["b_hh_b"]).reshape(4, H), perm, axis=0)
    bias = jnp.concatenate([b_f, b_b], axis=1).reshape(1, 8 * H)            # (1, 8H)
    return wih2, whh2, bias


def rnn_encoder_forward(src_emb, lengths, params):
    T, B, E = src_emb.shape
    H = params["whh_f"].shape[0]

    wih2, whh2, bias = _fuse_params(params, E, H)

    # fwd lanes read src[t], bwd lanes read src[T-1-t]: pre-pair them on the K dim
    src2 = jnp.concatenate([src_emb, src_emb[::-1]], axis=-1).reshape(T * B, 2 * E)

    len2d = lengths.reshape(B, 1).astype(jnp.int32)

    vmem = pl.BlockSpec(memory_space=pltpu.MemorySpace.VMEM)
    out_shapes = (
        jax.ShapeDtypeStruct((T, B, 2 * H), jnp.float32),   # memory bank
        jax.ShapeDtypeStruct((B, 2 * H), jnp.float32),      # [h_fwd | h_bwd]
        jax.ShapeDtypeStruct((B, 2 * H), jnp.float32),      # [c_fwd | c_bwd]
    )

    memory_bank, hn_cat, cn_cat = pl.pallas_call(
        bilstm_fused_kernel,
        out_shape=out_shapes,
        in_specs=[vmem] * 5,
        out_specs=(vmem, vmem, vmem),
    )(src2.astype(jnp.bfloat16), len2d,
      wih2.astype(jnp.bfloat16), whh2.astype(jnp.bfloat16), bias)

    h_n = jnp.stack([hn_cat[:, :H], hn_cat[:, H:]], axis=0)   # (2, B, H)
    c_n = jnp.stack([cn_cat[:, :H], cn_cat[:, H:]], axis=0)   # (2, B, H)
    return memory_bank, (h_n, c_n), lengths


# ----------------------------------------------------------------------------
# Pure-JAX reference (mirrors torch pack -> LSTM -> unpack semantics),
# intentionally written per-direction (unfused) as an independent check.
# ----------------------------------------------------------------------------
def rnn_encoder_reference(src_emb, lengths, params):
    T, B, E = src_emb.shape
    H = params["whh_f"].shape[0]
    b_f = (params["b_ih_f"] + params["b_hh_f"]).reshape(1, 4 * H)
    b_b = (params["b_ih_b"] + params["b_hh_b"]).reshape(1, 4 * H)
    lens = lengths.reshape(B, 1)

    def cell(x, h, c, wih, whh, b):
        gates = x @ wih + h @ whh + b
        i = jax.nn.sigmoid(gates[:, 0 * H:1 * H])
        f = jax.nn.sigmoid(gates[:, 1 * H:2 * H])
        g = jnp.tanh(gates[:, 2 * H:3 * H])
        o = jax.nn.sigmoid(gates[:, 3 * H:4 * H])
        c_new = f * c + i * g
        h_new = o * jnp.tanh(c_new)
        return h_new, c_new

    def run(direction):
        wih = params[f"wih_{direction}"]
        whh = params[f"whh_{direction}"]
        b = b_f if direction == "f" else b_b
        h = jnp.zeros((B, H), jnp.float32)
        c = jnp.zeros((B, H), jnp.float32)
        outs = [None] * T
        ts = range(T) if direction == "f" else range(T - 1, -1, -1)
        for t in ts:
            h_new, c_new = cell(src_emb[t], h, c, wih, whh, b)
            mask = (lens > t).astype(jnp.float32)
            h = mask * h_new + (1.0 - mask) * h
            c = mask * c_new + (1.0 - mask) * c
            outs[t] = mask * h_new
        return jnp.stack(outs, axis=0), h, c

    of, hf, cf = run("f")
    ob, hb, cb = run("b")
    memory_bank = jnp.concatenate([of, ob], axis=-1)
    h_n = jnp.stack([hf, hb], axis=0)
    c_n = jnp.stack([cf, cb], axis=0)
    return memory_bank, (h_n, c_n), lengths


# ----------------------------------------------------------------------------
def init_params(key, emb_size, hidden_per_dir):
    E, H = emb_size, hidden_per_dir
    k = 1.0 / np.sqrt(H)
    names_shapes = [
        ("wih_f", (E, 4 * H)), ("whh_f", (H, 4 * H)),
        ("b_ih_f", (4 * H,)), ("b_hh_f", (4 * H,)),
        ("wih_b", (E, 4 * H)), ("whh_b", (H, 4 * H)),
        ("b_ih_b", (4 * H,)), ("b_hh_b", (4 * H,)),
    ]
    params = {}
    keys = jax.random.split(key, len(names_shapes))
    for (name, shape), kk in zip(names_shapes, keys):
        params[name] = jax.random.uniform(kk, shape, jnp.float32, minval=-k, maxval=k)
    return params


if __name__ == "__main__":
    # small shapes: seq=8, batch=2, emb=32, hidden_size=32 (bidirectional -> 16/dir)
    T, B, E = 8, 2, 32
    HIDDEN = 32
    H = HIDDEN // 2

    key = jax.random.PRNGKey(0)
    k_emb, k_par = jax.random.split(key)
    src_emb = jax.random.normal(k_emb, (T, B, E), jnp.float32)
    lengths = jnp.array([8, 5], dtype=jnp.int32)       # sorted descending (pack req.)
    params = init_params(k_par, E, H)

    memory_bank, (h_n, c_n), out_lens = jax.jit(rnn_encoder_forward)(src_emb, lengths, params)
    jax.block_until_ready(memory_bank)
    jax.block_until_ready(h_n)
    jax.block_until_ready(c_n)

    # verify against pure-JAX f32 reference (kernel uses bf16 MXU operands,
    # f32 accumulation + state, and EUP approx reciprocal in sigmoid)
    ref_mb, (ref_hn, ref_cn), _ = rnn_encoder_reference(src_emb, lengths, params)
    np.testing.assert_allclose(np.asarray(memory_bank), np.asarray(ref_mb),
                               rtol=2e-2, atol=2e-2)
    np.testing.assert_allclose(np.asarray(h_n), np.asarray(ref_hn), rtol=2e-2, atol=2e-2)
    np.testing.assert_allclose(np.asarray(c_n), np.asarray(ref_cn), rtol=2e-2, atol=2e-2)

    assert memory_bank.shape == (T, B, HIDDEN)
    assert h_n.shape == (2, B, H) and c_n.shape == (2, B, H)
    print("KERNEL_OK")
</pallas_src>

<mosaic_0001>
module attributes {stable_mosaic.version = 11 : i64} {
  func.func @bilstm_fused_kernel(%arg0: memref<16x64xbf16, #tpu.memory_space<vmem>>, %arg1: memref<2x1xi32, #tpu.memory_space<vmem>>, %arg2: memref<64x128xbf16, #tpu.memory_space<vmem>>, %arg3: memref<32x128xbf16, #tpu.memory_space<vmem>>, %arg4: memref<1x128xf32, #tpu.memory_space<vmem>>, %arg5: memref<8x2x32xf32, #tpu.memory_space<vmem>>, %arg6: memref<2x32xf32, #tpu.memory_space<vmem>>, %arg7: memref<2x32xf32, #tpu.memory_space<vmem>>) attributes {dimension_semantics = [], scalar_prefetch = 0 : i64, scratch_operands = 0 : i64, tpu.core_type = #tpu.core_type<tc>} {
    %c0 = arith.constant 0 : index
    %c0_0 = arith.constant 0 : index
    %0 = vector.load %arg1[%c0, %c0_0] : memref<2x1xi32, #tpu.memory_space<vmem>>, vector<2x1xi32>
    %c0_1 = arith.constant 0 : index
    %c0_2 = arith.constant 0 : index
    %1 = vector.load %arg2[%c0_1, %c0_2] : memref<64x128xbf16, #tpu.memory_space<vmem>>, vector<64x128xbf16>
    %c0_3 = arith.constant 0 : index
    %c0_4 = arith.constant 0 : index
    %2 = vector.load %arg3[%c0_3, %c0_4] : memref<32x128xbf16, #tpu.memory_space<vmem>>, vector<32x128xbf16>
    %c0_5 = arith.constant 0 : index
    %c0_6 = arith.constant 0 : index
    %3 = vector.load %arg4[%c0_5, %c0_6] : memref<1x128xf32, #tpu.memory_space<vmem>>, vector<1x128xf32>
    %c0_7 = arith.constant 0 : index
    %c0_8 = arith.constant 0 : index
    %4 = vector.load %arg0[%c0_7, %c0_8] : memref<16x64xbf16, #tpu.memory_space<vmem>>, vector<16x64xbf16>
    %cst = arith.constant dense<0.000000e+00> : vector<16x128xf32>
    %5 = tpu.matmul %4, %1, %cst {dimension_numbers = #tpu.dot_dimension_numbers<[1], [0], [0], [1], [0, 0, 1, 1], [], []>} : vector<16x64xbf16>, vector<64x128xbf16>, vector<16x128xf32> -> vector<16x128xf32>
    %6 = vector.broadcast %3 : vector<1x128xf32> to vector<16x128xf32>
    %7 = arith.addf %5, %6 : vector<16x128xf32>
    %8 = tpu.iota {dimensions = array<i32: 0>} : vector<8x2x32xi32>
    %9 = tpu.iota {dimensions = array<i32: 2>} : vector<8x2x32xi32>
    %c16_i32 = arith.constant 16 : i32
    %10 = vector.broadcast %c16_i32 : i32 to vector<8x2x32xi32>
    %11 = arith.cmpi slt, %9, %10 : vector<8x2x32xi32>
    %c7_i32 = arith.constant 7 : i32
    %12 = vector.broadcast %c7_i32 : i32 to vector<8x2x32xi32>
    %13 = arith.subi %12, %8 : vector<8x2x32xi32>
    %14 = arith.select %11, %8, %13 : vector<8x2x32xi1>, vector<8x2x32xi32>
    %15 = vector.shape_cast %0 : vector<2x1xi32> to vector<1x2x1xi32>
    %16 = vector.broadcast %15 : vector<1x2x1xi32> to vector<8x2x32xi32>
    %17 = arith.cmpi sgt, %16, %14 : vector<8x2x32xi32>
    %cst_9 = arith.constant 0.000000e+00 : f32
    %18 = vector.broadcast %cst_9 : f32 to vector<2x32xf32>
    %cst_10 = arith.constant 0.000000e+00 : f32
    %19 = vector.broadcast %cst_10 : f32 to vector<2x32xf32>
    %20 = vector.extract_strided_slice %7 {offsets = [0, 0], sizes = [2, 128], strides = [1, 1]} : vector<16x128xf32> to vector<2x128xf32>
    %21 = arith.truncf %18 : vector<2x32xf32> to vector<2x32xbf16>
    %cst_11 = arith.constant dense<0.000000e+00> : vector<2x128xf32>
    %22 = tpu.matmul %21, %2, %cst_11 {dimension_numbers = #tpu.dot_dimension_numbers<[1], [0], [0], [1], [0, 0, 1, 1], [], []>} : vector<2x32xbf16>, vector<32x128xbf16>, vector<2x128xf32> -> vector<2x128xf32>
    %23 = arith.addf %20, %22 : vector<2x128xf32>
    %24 = vector.extract_strided_slice %23 {offsets = [0, 0], sizes = [2, 96], strides = [1, 1]} : vector<2x128xf32> to vector<2x96xf32>
    %cst_12 = arith.constant 0.000000e+00 : f32
    %25 = vector.broadcast %cst_12 : f32 to vector<2x96xf32>
    %26 = arith.subf %25, %24 : vector<2x96xf32>
    %27 = math.exp %26 : vector<2x96xf32>
    %cst_13 = arith.constant 1.000000e+00 : f32
    %28 = vector.broadcast %cst_13 : f32 to vector<2x96xf32>
    %29 = arith.addf %28, %27 : vector<2x96xf32>
    %30 = tpu.reciprocal %29 {approx = true} : vector<2x96xf32> -> vector<2x96xf32>
    %31 = vector.extract_strided_slice %30 {offsets = [0, 0], sizes = [2, 32], strides = [1, 1]} : vector<2x96xf32> to vector<2x32xf32>
    %32 = vector.extract_strided_slice %30 {offsets = [0, 32], sizes = [2, 32], strides = [1, 1]} : vector<2x96xf32> to vector<2x32xf32>
    %33 = vector.extract_strided_slice %30 {offsets = [0, 64], sizes = [2, 32], strides = [1, 1]} : vector<2x96xf32> to vector<2x32xf32>
    %34 = vector.extract_strided_slice %23 {offsets = [0, 96], sizes = [2, 32], strides = [1, 1]} : vector<2x128xf32> to vector<2x32xf32>
    %35 = math.tanh %34 : vector<2x32xf32>
    %36 = arith.mulf %32, %19 : vector<2x32xf32>
    %37 = arith.mulf %31, %35 : vector<2x32xf32>
    %38 = arith.addf %36, %37 : vector<2x32xf32>
    %39 = math.tanh %38 : vector<2x32xf32>
    %40 = arith.mulf %33, %39 : vector<2x32xf32>
    %41 = vector.extract_strided_slice %17 {offsets = [0, 0, 0], sizes = [1, 2, 32], strides = [1, 1, 1]} : vector<8x2x32xi1> to vector<1x2x32xi1>
    %42 = vector.shape_cast %41 : vector<1x2x32xi1> to vector<2x32xi1>
    %cst_14 = arith.constant 0.000000e+00 : f32
    %43 = vector.broadcast %cst_14 : f32 to vector<2x32xf32>
    %44 = arith.select %42, %40, %43 : vector<2x32xi1>, vector<2x32xf32>
    %45 = arith.select %42, %40, %18 : vector<2x32xi1>, vector<2x32xf32>
    %46 = arith.select %42, %38, %19 : vector<2x32xi1>, vector<2x32xf32>
    %47 = vector.extract_strided_slice %44 {offsets = [0, 0], sizes = [2, 16], strides = [1, 1]} : vector<2x32xf32> to vector<2x16xf32>
    %48 = vector.extract_strided_slice %44 {offsets = [0, 16], sizes = [2, 16], strides = [1, 1]} : vector<2x32xf32> to vector<2x16xf32>
    %49 = vector.extract_strided_slice %7 {offsets = [2, 0], sizes = [2, 128], strides = [1, 1]} : vector<16x128xf32> to vector<2x128xf32>
    %50 = arith.truncf %45 : vector<2x32xf32> to vector<2x32xbf16>
    %cst_15 = arith.constant dense<0.000000e+00> : vector<2x128xf32>
    %51 = tpu.matmul %50, %2, %cst_15 {dimension_numbers = #tpu.dot_dimension_numbers<[1], [0], [0], [1], [0, 0, 1, 1], [], []>} : vector<2x32xbf16>, vector<32x128xbf16>, vector<2x128xf32> -> vector<2x128xf32>
    %52 = arith.addf %49, %51 : vector<2x128xf32>
    %53 = vector.extract_strided_slice %52 {offsets = [0, 0], sizes = [2, 96], strides = [1, 1]} : vector<2x128xf32> to vector<2x96xf32>
    %cst_16 = arith.constant 0.000000e+00 : f32
    %54 = vector.broadcast %cst_16 : f32 to vector<2x96xf32>
    %55 = arith.subf %54, %53 : vector<2x96xf32>
    %56 = math.exp %55 : vector<2x96xf32>
    %cst_17 = arith.constant 1.000000e+00 : f32
    %57 = vector.broadcast %cst_17 : f32 to vector<2x96xf32>
    %58 = arith.addf %57, %56 : vector<2x96xf32>
    %59 = tpu.reciprocal %58 {approx = true} : vector<2x96xf32> -> vector<2x96xf32>
    %60 = vector.extract_strided_slice %59 {offsets = [0, 0], sizes = [2, 32], strides = [1, 1]} : vector<2x96xf32> to vector<2x32xf32>
    %61 = vector.extract_strided_slice %59 {offsets = [0, 32], sizes = [2, 32], strides = [1, 1]} : vector<2x96xf32> to vector<2x32xf32>
    %62 = vector.extract_strided_slice %59 {offsets = [0, 64], sizes = [2, 32], strides = [1, 1]} : vector<2x96xf32> to vector<2x32xf32>
    %63 = vector.extract_strided_slice %52 {offsets = [0, 96], sizes = [2, 32], strides = [1, 1]} : vector<2x128xf32> to vector<2x32xf32>
    %64 = math.tanh %63 : vector<2x32xf32>
    %65 = arith.mulf %61, %46 : vector<2x32xf32>
    %66 = arith.mulf %60, %64 : vector<2x32xf32>
    %67 = arith.addf %65, %66 : vector<2x32xf32>
    %68 = math.tanh %67 : vector<2x32xf32>
    %69 = arith.mulf %62, %68 : vector<2x32xf32>
    %70 = vector.extract_strided_slice %17 {offsets = [1, 0, 0], sizes = [1, 2, 32], strides = [1, 1, 1]} : vector<8x2x32xi1> to vector<1x2x32xi1>
    %71 = vector.shape_cast %70 : vector<1x2x32xi1> to vector<2x32xi1>
    %cst_18 = arith.constant 0.000000e+00 : f32
    %72 = vector.broadcast %cst_18 : f32 to vector<2x32xf32>
    %73 = arith.select %71, %69, %72 : vector<2x32xi1>, vector<2x32xf32>
    %74 = arith.select %71, %69, %45 : vector<2x32xi1>, vector<2x32xf32>
    %75 = arith.select %71, %67, %46 : vector<2x32xi1>, vector<2x32xf32>
    %76 = vector.extract_strided_slice %73 {offsets = [0, 0], sizes = [2, 16], strides = [1, 1]} : vector<2x32xf32> to vector<2x16xf32>
    %77 = vector.extract_strided_slice %73 {offsets = [0, 16], sizes = [2, 16], strides = [1, 1]} : vector<2x32xf32> to vector<2x16xf32>
    %78 = vector.extract_strided_slice %7 {offsets = [4, 0], sizes = [2, 128], strides = [1, 1]} : vector<16x128xf32> to vector<2x128xf32>
    %79 = arith.truncf %74 : vector<2x32xf32> to vector<2x32xbf16>
    %cst_19 = arith.constant dense<0.000000e+00> : vector<2x128xf32>
    %80 = tpu.matmul %79, %2, %cst_19 {dimension_numbers = #tpu.dot_dimension_numbers<[1], [0], [0], [1], [0, 0, 1, 1], [], []>} : vector<2x32xbf16>, vector<32x128xbf16>, vector<2x128xf32> -> vector<2x128xf32>
    %81 = arith.addf %78, %80 : vector<2x128xf32>
    %82 = vector.extract_strided_slice %81 {offsets = [0, 0], sizes = [2, 96], strides = [1, 1]} : vector<2x128xf32> to vector<2x96xf32>
    %cst_20 = arith.constant 0.000000e+00 : f32
    %83 = vector.broadcast %cst_20 : f32 to vector<2x96xf32>
    %84 = arith.subf %83, %82 : vector<2x96xf32>
    %85 = math.exp %84 : vector<2x96xf32>
    %cst_21 = arith.constant 1.000000e+00 : f32
    %86 = vector.broadcast %cst_21 : f32 to vector<2x96xf32>
    %87 = arith.addf %86, %85 : vector<2x96xf32>
    %88 = tpu.reciprocal %87 {approx = true} : vector<2x96xf32> -> vector<2x96xf32>
    %89 = vector.extract_strided_slice %88 {offsets = [0, 0], sizes = [2, 32], strides = [1, 1]} : vector<2x96xf32> to vector<2x32xf32>
    %90 = vector.extract_strided_slice %88 {offsets = [0, 32], sizes = [2, 32], strides = [1, 1]} : vector<2x96xf32> to vector<2x32xf32>
    %91 = vector.extract_strided_slice %88 {offsets = [0, 64], sizes = [2, 32], strides = [1, 1]} : vector<2x96xf32> to vector<2x32xf32>
    %92 = vector.extract_strided_slice %81 {offsets = [0, 96], sizes = [2, 32], strides = [1, 1]} : vector<2x128xf32> to vector<2x32xf32>
    %93 = math.tanh %92 : vector<2x32xf32>
    %94 = arith.mulf %90, %75 : vector<2x32xf32>
    %95 = arith.mulf %89, %93 : vector<2x32xf32>
    %96 = arith.addf %94, %95 : vector<2x32xf32>
    %97 = math.tanh %96 : vector<2x32xf32>
    %98 = arith.mulf %91, %97 : vector<2x32xf32>
    %99 = vector.extract_strided_slice %17 {offsets = [2, 0, 0], sizes = [1, 2, 32], strides = [1, 1, 1]} : vector<8x2x32xi1> to vector<1x2x32xi1>
    %100 = vector.shape_cast %99 : vector<1x2x32xi1> to vector<2x32xi1>
    %cst_22 = arith.constant 0.000000e+00 : f32
    %101 = vector.broadcast %cst_22 : f32 to vector<2x32xf32>
    %102 = arith.select %100, %98, %101 : vector<2x32xi1>, vector<2x32xf32>
    %103 = arith.select %100, %98, %74 : vector<2x32xi1>, vector<2x32xf32>
    %104 = arith.select %100, %96, %75 : vector<2x32xi1>, vector<2x32xf32>
    %105 = vector.extract_strided_slice %102 {offsets = [0, 0], sizes = [2, 16], strides = [1, 1]} : vector<2x32xf32> to vector<2x16xf32>
    %106 = vector.extract_strided_slice %102 {offsets = [0, 16], sizes = [2, 16], strides = [1, 1]} : vector<2x32xf32> to vector<2x16xf32>
    %107 = vector.extract_strided_slice %7 {offsets = [6, 0], sizes = [2, 128], strides = [1, 1]} : vector<16x128xf32> to vector<2x128xf32>
    %108 = arith.truncf %103 : vector<2x32xf32> to vector<2x32xbf16>
    %cst_23 = arith.constant dense<0.000000e+00> : vector<2x128xf32>
    %109 = tpu.matmul %108, %2, %cst_23 {dimension_numbers = #tpu.dot_dimension_numbers<[1], [0], [0], [1], [0, 0, 1, 1], [], []>} : vector<2x32xbf16>, vector<32x128xbf16>, vector<2x128xf32> -> vector<2x128xf32>
    %110 = arith.addf %107, %109 : vector<2x128xf32>
    %111 = vector.extract_strided_slice %110 {offsets = [0, 0], sizes = [2, 96], strides = [1, 1]} : vector<2x128xf32> to vector<2x96xf32>
    %cst_24 = arith.constant 0.000000e+00 : f32
    %112 = vector.broadcast %cst_24 : f32 to vector<2x96xf32>
    %113 = arith.subf %112, %111 : vector<2x96xf32>
    %114 = math.exp %113 : vector<2x96xf32>
    %cst_25 = arith.constant 1.000000e+00 : f32
    %115 = vector.broadcast %cst_25 : f32 to vector<2x96xf32>
    %116 = arith.addf %115, %114 : vector<2x96xf32>
    %117 = tpu.reciprocal %116 {approx = true} : vector<2x96xf32> -> vector<2x96xf32>
    %118 = vector.extract_strided_slice %117 {offsets = [0, 0], sizes = [2, 32], strides = [1, 1]} : vector<2x96xf32> to vector<2x32xf32>
    %119 = vector.extract_strided_slice %117 {offsets = [0, 32], sizes = [2, 32], strides = [1, 1]} : vector<2x96xf32> to vector<2x32xf32>
    %120 = vector.extract_strided_slice %117 {offsets = [0, 64], sizes = [2, 32], strides = [1, 1]} : vector<2x96xf32> to vector<2x32xf32>
    %121 = vector.extract_strided_slice %110 {offsets = [0, 96], sizes = [2, 32], strides = [1, 1]} : vector<2x128xf32> to vector<2x32xf32>
    %122 = math.tanh %121 : vector<2x32xf32>
    %123 = arith.mulf %119, %104 : vector<2x32xf32>
    %124 = arith.mulf %118, %122 : vector<2x32xf32>
    %125 = arith.addf %123, %124 : vector<2x32xf32>
    %126 = math.tanh %125 : vector<2x32xf32>
    %127 = arith.mulf %120, %126 : vector<2x32xf32>
    %128 = vector.extract_strided_slice %17 {offsets = [3, 0, 0], sizes = [1, 2, 32], strides = [1, 1, 1]} : vector<8x2x32xi1> to vector<1x2x32xi1>
    %129 = vector.shape_cast %128 : vector<1x2x32xi1> to vector<2x32xi1>
    %cst_26 = arith.constant 0.000000e+00 : f32
    %130 = vector.broadcast %cst_26 : f32 to vector<2x32xf32>
    %131 = arith.select %129, %127, %130 : vector<2x32xi1>, vector<2x32xf32>
    %132 = arith.select %129, %127, %103 : vector<2x32xi1>, vector<2x32xf32>
    %133 = arith.select %129, %125, %104 : vector<2x32xi1>, vector<2x32xf32>
    %134 = vector.extract_strided_slice %131 {offsets = [0, 0], sizes = [2, 16], strides = [1, 1]} : vector<2x32xf32> to vector<2x16xf32>
    %135 = vector.extract_strided_slice %131 {offsets = [0, 16], sizes = [2, 16], strides = [1, 1]} : vector<2x32xf32> to vector<2x16xf32>
    %136 = vector.extract_strided_slice %7 {offsets = [8, 0], sizes = [2, 128], strides = [1, 1]} : vector<16x128xf32> to vector<2x128xf32>
    %137 = arith.truncf %132 : vector<2x32xf32> to vector<2x32xbf16>
    %cst_27 = arith.constant dense<0.000000e+00> : vector<2x128xf32>
    %138 = tpu.matmul %137, %2, %cst_27 {dimension_numbers = #tpu.dot_dimension_numbers<[1], [0], [0], [1], [0, 0, 1, 1], [], []>} : vector<2x32xbf16>, vector<32x128xbf16>, vector<2x128xf32> -> vector<2x128xf32>
    %139 = arith.addf %136, %138 : vector<2x128xf32>
    %140 = vector.extract_strided_slice %139 {offsets = [0, 0], sizes = [2, 96], strides = [1, 1]} : vector<2x128xf32> to vector<2x96xf32>
    %cst_28 = arith.constant 0.000000e+00 : f32
    %141 = vector.broadcast %cst_28 : f32 to vector<2x96xf32>
    %142 = arith.subf %141, %140 : vector<2x96xf32>
    %143 = math.exp %142 : vector<2x96xf32>
    %cst_29 = arith.constant 1.000000e+00 : f32
    %144 = vector.broadcast %cst_29 : f32 to vector<2x96xf32>
    %145 = arith.addf %144, %143 : vector<2x96xf32>
    %146 = tpu.reciprocal %145 {approx = true} : vector<2x96xf32> -> vector<2x96xf32>
    %147 = vector.extract_strided_slice %146 {offsets = [0, 0], sizes = [2, 32], strides = [1, 1]} : vector<2x96xf32> to vector<2x32xf32>
    %148 = vector.extract_strided_slice %146 {offsets = [0, 32], sizes = [2, 32], strides = [1, 1]} : vector<2x96xf32> to vector<2x32xf32>
    %149 = vector.extract_strided_slice %146 {offsets = [0, 64], sizes = [2, 32], strides = [1, 1]} : vector<2x96xf32> to vector<2x32xf32>
    %150 = vector.extract_strided_slice %139 {offsets = [0, 96], sizes = [2, 32], strides = [1, 1]} : vector<2x128xf32> to vector<2x32xf32>
    %151 = math.tanh %150 : vector<2x32xf32>
    %152 = arith.mulf %148, %133 : vector<2x32xf32>
    %153 = arith.mulf %147, %151 : vector<2x32xf32>
    %154 = arith.addf %152, %153 : vector<2x32xf32>
    %155 = math.tanh %154 : vector<2x32xf32>
    %156 = arith.mulf %149, %155 : vector<2x32xf32>
    %157 = vector.extract_strided_slice %17 {offsets = [4, 0, 0], sizes = [1, 2, 32], strides = [1, 1, 1]} : vector<8x2x32xi1> to vector<1x2x32xi1>
    %158 = vector.shape_cast %157 : vector<1x2x32xi1> to vector<2x32xi1>
    %cst_30 = arith.constant 0.000000e+00 : f32
    %159 = vector.broadcast %cst_30 : f32 to vector<2x32xf32>
    %160 = arith.select %158, %156, %159 : vector<2x32xi1>, vector<2x32xf32>
    %161 = arith.select %158, %156, %132 : vector<2x32xi1>, vector<2x32xf32>
    %162 = arith.select %158, %154, %133 : vector<2x32xi1>, vector<2x32xf32>
    %163 = vector.extract_strided_slice %160 {offsets = [0, 0], sizes = [2, 16], strides = [1, 1]} : vector<2x32xf32> to vector<2x16xf32>
    %164 = vector.extract_strided_slice %160 {offsets = [0, 16], sizes = [2, 16], strides = [1, 1]} : vector<2x32xf32> to vector<2x16xf32>
    %165 = vector.extract_strided_slice %7 {offsets = [10, 0], sizes = [2, 128], strides = [1, 1]} : vector<16x128xf32> to vector<2x128xf32>
    %166 = arith.truncf %161 : vector<2x32xf32> to vector<2x32xbf16>
    %cst_31 = arith.constant dense<0.000000e+00> : vector<2x128xf32>
    %167 = tpu.matmul %166, %2, %cst_31 {dimension_numbers = #tpu.dot_dimension_numbers<[1], [0], [0], [1], [0, 0, 1, 1], [], []>} : vector<2x32xbf16>, vector<32x128xbf16>, vector<2x128xf32> -> vector<2x128xf32>
    %168 = arith.addf %165, %167 : vector<2x128xf32>
    %169 = vector.extract_strided_slice %168 {offsets = [0, 0], sizes = [2, 96], strides = [1, 1]} : vector<2x128xf32> to vector<2x96xf32>
    %cst_32 = arith.constant 0.000000e+00 : f32
    %170 = vector.broadcast %cst_32 : f32 to vector<2x96xf32>
    %171 = arith.subf %170, %169 : vector<2x96xf32>
    %172 = math.exp %171 : vector<2x96xf32>
    %cst_33 = arith.constant 1.000000e+00 : f32
    %173 = vector.broadcast %cst_33 : f32 to vector<2x96xf32>
    %174 = arith.addf %173, %172 : vector<2x96xf32>
    %175 = tpu.reciprocal %174 {approx = true} : vector<2x96xf32> -> vector<2x96xf32>
    %176 = vector.extract_strided_slice %175 {offsets = [0, 0], sizes = [2, 32], strides = [1, 1]} : vector<2x96xf32> to vector<2x32xf32>
    %177 = vector.extract_strided_slice %175 {offsets = [0, 32], sizes = [2, 32], strides = [1, 1]} : vector<2x96xf32> to vector<2x32xf32>
    %178 = vector.extract_strided_slice %175 {offsets = [0, 64], sizes = [2, 32], strides = [1, 1]} : vector<2x96xf32> to vector<2x32xf32>
    %179 = vector.extract_strided_slice %168 {offsets = [0, 96], sizes = [2, 32], strides = [1, 1]} : vector<2x128xf32> to vector<2x32xf32>
    %180 = math.tanh %179 : vector<2x32xf32>
    %181 = arith.mulf %177, %162 : vector<2x32xf32>
    %182 = arith.mulf %176, %180 : vector<2x32xf32>
    %183 = arith.addf %181, %182 : vector<2x32xf32>
    %184 = math.tanh %183 : vector<2x32xf32>
    %185 = arith.mulf %178, %184 : vector<2x32xf32>
    %186 = vector.extract_strided_slice %17 {offsets = [5, 0, 0], sizes = [1, 2, 32], strides = [1, 1, 1]} : vector<8x2x32xi1> to vector<1x2x32xi1>
    %187 = vector.shape_cast %186 : vector<1x2x32xi1> to vector<2x32xi1>
    %cst_34 = arith.constant 0.000000e+00 : f32
    %188 = vector.broadcast %cst_34 : f32 to vector<2x32xf32>
    %189 = arith.select %187, %185, %188 : vector<2x32xi1>, vector<2x32xf32>
    %190 = arith.select %187, %185, %161 : vector<2x32xi1>, vector<2x32xf32>
    %191 = arith.select %187, %183, %162 : vector<2x32xi1>, vector<2x32xf32>
    %192 = vector.extract_strided_slice %189 {offsets = [0, 0], sizes = [2, 16], strides = [1, 1]} : vector<2x32xf32> to vector<2x16xf32>
    %193 = vector.extract_strided_slice %189 {offsets = [0, 16], sizes = [2, 16], strides = [1, 1]} : vector<2x32xf32> to vector<2x16xf32>
    %194 = vector.extract_strided_slice %7 {offsets = [12, 0], sizes = [2, 128], strides = [1, 1]} : vector<16x128xf32> to vector<2x128xf32>
    %195 = arith.truncf %190 : vector<2x32xf32> to vector<2x32xbf16>
    %cst_35 = arith.constant dense<0.000000e+00> : vector<2x128xf32>
    %196 = tpu.matmul %195, %2, %cst_35 {dimension_numbers = #tpu.dot_dimension_numbers<[1], [0], [0], [1], [0, 0, 1, 1], [], []>} : vector<2x32xbf16>, vector<32x128xbf16>, vector<2x128xf32> -> vector<2x128xf32>
    %197 = arith.addf %194, %196 : vector<2x128xf32>
    %198 = vector.extract_strided_slice %197 {offsets = [0, 0], sizes = [2, 96], strides = [1, 1]} : vector<2x128xf32> to vector<2x96xf32>
    %cst_36 = arith.constant 0.000000e+00 : f32
    %199 = vector.broadcast %cst_36 : f32 to vector<2x96xf32>
    %200 = arith.subf %199, %198 : vector<2x96xf32>
    %201 = math.exp %200 : vector<2x96xf32>
    %cst_37 = arith.constant 1.000000e+00 : f32
    %202 = vector.broadcast %cst_37 : f32 to vector<2x96xf32>
    %203 = arith.addf %202, %201 : vector<2x96xf32>
    %204 = tpu.reciprocal %203 {approx = true} : vector<2x96xf32> -> vector<2x96xf32>
    %205 = vector.extract_strided_slice %204 {offsets = [0, 0], sizes = [2, 32], strides = [1, 1]} : vector<2x96xf32> to vector<2x32xf32>
    %206 = vector.extract_strided_slice %204 {offsets = [0, 32], sizes = [2, 32], strides = [1, 1]} : vector<2x96xf32> to vector<2x32xf32>
    %207 = vector.extract_strided_slice %204 {offsets = [0, 64], sizes = [2, 32], strides = [1, 1]} : vector<2x96xf32> to vector<2x32xf32>
    %208 = vector.extract_strided_slice %197 {offsets = [0, 96], sizes = [2, 32], strides = [1, 1]} : vector<2x128xf32> to vector<2x32xf32>
    %209 = math.tanh %208 : vector<2x32xf32>
    %210 = arith.mulf %206, %191 : vector<2x32xf32>
    %211 = arith.mulf %205, %209 : vector<2x32xf32>
    %212 = arith.addf %210, %211 : vector<2x32xf32>
    %213 = math.tanh %212 : vector<2x32xf32>
    %214 = arith.mulf %207, %213 : vector<2x32xf32>
    %215 = vector.extract_strided_slice %17 {offsets = [6, 0, 0], sizes = [1, 2, 32], strides = [1, 1, 1]} : vector<8x2x32xi1> to vector<1x2x32xi1>
    %216 = vector.shape_cast %215 : vector<1x2x32xi1> to vector<2x32xi1>
    %cst_38 = arith.constant 0.000000e+00 : f32
    %217 = vector.broadcast %cst_38 : f32 to vector<2x32xf32>
    %218 = arith.select %216, %214, %217 : vector<2x32xi1>, vector<2x32xf32>
    %219 = arith.select %216, %214, %190 : vector<2x32xi1>, vector<2x32xf32>
    %220 = arith.select %216, %212, %191 : vector<2x32xi1>, vector<2x32xf32>
    %221 = vector.extract_strided_slice %218 {offsets = [0, 0], sizes = [2, 16], strides = [1, 1]} : vector<2x32xf32> to vector<2x16xf32>
    %222 = vector.extract_strided_slice %218 {offsets = [0, 16], sizes = [2, 16], strides = [1, 1]} : vector<2x32xf32> to vector<2x16xf32>
    %223 = vector.extract_strided_slice %7 {offsets = [14, 0], sizes = [2, 128], strides = [1, 1]} : vector<16x128xf32> to vector<2x128xf32>
    %224 = arith.truncf %219 : vector<2x32xf32> to vector<2x32xbf16>
    %cst_39 = arith.constant dense<0.000000e+00> : vector<2x128xf32>
    %225 = tpu.matmul %224, %2, %cst_39 {dimension_numbers = #tpu.dot_dimension_numbers<[1], [0], [0], [1], [0, 0, 1, 1], [], []>} : vector<2x32xbf16>, vector<32x128xbf16>, vector<2x128xf32> -> vector<2x128xf32>
    %226 = arith.addf %223, %225 : vector<2x128xf32>
    %227 = vector.extract_strided_slice %226 {offsets = [0, 0], sizes = [2, 96], strides = [1, 1]} : vector<2x128xf32> to vector<2x96xf32>
    %cst_40 = arith.constant 0.000000e+00 : f32
    %228 = vector.broadcast %cst_40 : f32 to vector<2x96xf32>
    %229 = arith.subf %228, %227 : vector<2x96xf32>
    %230 = math.exp %229 : vector<2x96xf32>
    %cst_41 = arith.constant 1.000000e+00 : f32
    %231 = vector.broadcast %cst_41 : f32 to vector<2x96xf32>
    %232 = arith.addf %231, %230 : vector<2x96xf32>
    %233 = tpu.reciprocal %232 {approx = true} : vector<2x96xf32> -> vector<2x96xf32>
    %234 = vector.extract_strided_slice %233 {offsets = [0, 0], sizes = [2, 32], strides = [1, 1]} : vector<2x96xf32> to vector<2x32xf32>
    %235 = vector.extract_strided_slice %233 {offsets = [0, 32], sizes = [2, 32], strides = [1, 1]} : vector<2x96xf32> to vector<2x32xf32>
    %236 = vector.extract_strided_slice %233 {offsets = [0, 64], sizes = [2, 32], strides = [1, 1]} : vector<2x96xf32> to vector<2x32xf32>
    %237 = vector.extract_strided_slice %226 {offsets = [0, 96], sizes = [2, 32], strides = [1, 1]} : vector<2x128xf32> to vector<2x32xf32>
    %238 = math.tanh %237 : vector<2x32xf32>
    %239 = arith.mulf %235, %220 : vector<2x32xf32>
    %240 = arith.mulf %234, %238 : vector<2x32xf32>
    %241 = arith.addf %239, %240 : vector<2x32xf32>
    %242 = math.tanh %241 : vector<2x32xf32>
    %243 = arith.mulf %236, %242 : vector<2x32xf32>
    %244 = vector.extract_strided_slice %17 {offsets = [7, 0, 0], sizes = [1, 2, 32], strides = [1, 1, 1]} : vector<8x2x32xi1> to vector<1x2x32xi1>
    %245 = vector.shape_cast %244 : vector<1x2x32xi1> to vector<2x32xi1>
    %cst_42 = arith.constant 0.000000e+00 : f32
    %246 = vector.broadcast %cst_42 : f32 to vector<2x32xf32>
    %247 = arith.select %245, %243, %246 : vector<2x32xi1>, vector<2x32xf32>
    %248 = arith.select %245, %243, %219 : vector<2x32xi1>, vector<2x32xf32>
    %249 = arith.select %245, %241, %220 : vector<2x32xi1>, vector<2x32xf32>
    %250 = vector.extract_strided_slice %247 {offsets = [0, 0], sizes = [2, 16], strides = [1, 1]} : vector<2x32xf32> to vector<2x16xf32>
    %251 = vector.extract_strided_slice %247 {offsets = [0, 16], sizes = [2, 16], strides = [1, 1]} : vector<2x32xf32> to vector<2x16xf32>
    %252 = vector.shape_cast %47 : vector<2x16xf32> to vector<1x2x16xf32>
    %253 = vector.shape_cast %76 : vector<2x16xf32> to vector<1x2x16xf32>
    %254 = vector.shape_cast %105 : vector<2x16xf32> to vector<1x2x16xf32>
    %255 = vector.shape_cast %134 : vector<2x16xf32> to vector<1x2x16xf32>
    %256 = vector.shape_cast %163 : vector<2x16xf32> to vector<1x2x16xf32>
    %257 = vector.shape_cast %192 : vector<2x16xf32> to vector<1x2x16xf32>
    %258 = vector.shape_cast %221 : vector<2x16xf32> to vector<1x2x16xf32>
    %259 = vector.shape_cast %250 : vector<2x16xf32> to vector<1x2x16xf32>
    %260 = tpu.concatenate %252, %253, %254, %255, %256, %257, %258, %259 in 0 : vector<1x2x16xf32>, vector<1x2x16xf32>, vector<1x2x16xf32>, vector<1x2x16xf32>, vector<1x2x16xf32>, vector<1x2x16xf32>, vector<1x2x16xf32>, vector<1x2x16xf32> -> vector<8x2x16xf32>
    %c0_43 = arith.constant 0 : index
    %c0_44 = arith.constant 0 : index
    %c0_45 = arith.constant 0 : index
    %261 = vector.load %arg5[%c0_43, %c0_44, %c0_45] : memref<8x2x32xf32, #tpu.memory_space<vmem>>, vector<8x2x16xf32>
    tpu.vector_store %arg5[%c0_43, %c0_44, %c0_45], %260 {strides = array<i32>} : memref<8x2x32xf32, #tpu.memory_space<vmem>>, vector<8x2x16xf32>,
    %262 = vector.shape_cast %251 : vector<2x16xf32> to vector<1x2x16xf32>
    %263 = vector.shape_cast %222 : vector<2x16xf32> to vector<1x2x16xf32>
    %264 = vector.shape_cast %193 : vector<2x16xf32> to vector<1x2x16xf32>
    %265 = vector.shape_cast %164 : vector<2x16xf32> to vector<1x2x16xf32>
    %266 = vector.shape_cast %135 : vector<2x16xf32> to vector<1x2x16xf32>
    %267 = vector.shape_cast %106 : vector<2x16xf32> to vector<1x2x16xf32>
    %268 = vector.shape_cast %77 : vector<2x16xf32> to vector<1x2x16xf32>
    %269 = vector.shape_cast %48 : vector<2x16xf32> to vector<1x2x16xf32>
    %270 = tpu.concatenate %262, %263, %264, %265, %266, %267, %268, %269 in 0 : vector<1x2x16xf32>, vector<1x2x16xf32>, vector<1x2x16xf32>, vector<1x2x16xf32>, vector<1x2x16xf32>, vector<1x2x16xf32>, vector<1x2x16xf32>, vector<1x2x16xf32> -> vector<8x2x16xf32>
    %c0_46 = arith.constant 0 : index
    %c0_47 = arith.constant 0 : index
    %c16 = arith.constant 16 : index
    %271 = vector.load %arg5[%c0_46, %c0_47, %c16] : memref<8x2x32xf32, #tpu.memory_space<vmem>>, vector<8x2x16xf32>
    tpu.vector_store %arg5[%c0_46, %c0_47, %c16], %270 {strides = array<i32>} : memref<8x2x32xf32, #tpu.memory_space<vmem>>, vector<8x2x16xf32>,
    %c0_48 = arith.constant 0 : index
    %c0_49 = arith.constant 0 : index
    %272 = vector.load %arg6[%c0_48, %c0_49] : memref<2x32xf32, #tpu.memory_space<vmem>>, vector<2x32xf32>
    tpu.vector_store %arg6[%c0_48, %c0_49], %248 {strides = array<i32>} : memref<2x32xf32, #tpu.memory_space<vmem>>, vector<2x32xf32>,
    %c0_50 = arith.constant 0 : index
    %c0_51 = arith.constant 0 : index
    %273 = vector.load %arg7[%c0_50, %c0_51] : memref<2x32xf32, #tpu.memory_space<vmem>>, vector<2x32xf32>
    tpu.vector_store %arg7[%c0_50, %c0_51], %249 {strides = array<i32>} : memref<2x32xf32, #tpu.memory_space<vmem>>, vector<2x32xf32>,
    return
  }
}

</mosaic_0001>

<bundles_post_ra>
// kernel: rnn_encoder_forward.1
= control target key start
LH: loop header
LB: loop body
LE: loop exit
PB: predicated region body
PF: predicated region fallthrough
CT: control target
= control target key end

     0   :  { %v800_v3 = vmov 0   ;;  %s1027_s0 = inlined_call_operand.vmem [shape: bf16[16,64], index: 0, kind: input, shape index: {}]   ;;  %s1028_s1 = inlined_call_operand.vmem [shape: s32[2,1], index: 1, kind: input, shape index: {}]   ;;  %s1029_s2 = inlined_call_operand.vmem [shape: bf16[64,128], index: 2, kind: input, shape index: {}]   ;;  %s1030_s3 = inlined_call_operand.vmem [shape: bf16[32,128], index: 3, kind: input, shape index: {}]   ;;  %s1031_s4 = inlined_call_operand.vmem [shape: f32[1,128], index: 4, kind: input, shape index: {}]   ;;  %s1032_s5 = inlined_call_operand.hbm [shape: f32[8,2,32], index: 5, kind: output, shape index: {0}]   ;;  %s1033_s6 = inlined_call_operand.vmem [shape: f32[2,32], index: 6, kind: output, shape index: {1}]   ;;  %s1034_s7 = inlined_call_operand.vmem [shape: f32[2,32], index: 7, kind: output, shape index: {2}]  }
   0x1   :  { %v690_v0 = vld [vmem:[%s1029_s2 + $0x18] sm:$0xff]  ;;  %v692_v1 = vld [vmem:[%s1030_s3 + $0x8] sm:$0xff]  ;;  %v689_v2 = vld [vmem:[%s1029_s2 + $0x10] sm:$0xff]  ;;  %707 = vset.pattern.permute.xlu1 %v800_v3  ;;  %708 = vset.pattern.permute.xlu0 %v800_v3 }
   0x2   :  { %81 = vmatpush.bf16.msra.mxu0 %v690_v0  ;;  %135 = vmatpush.bf16.msra.mxu1 %v692_v1  ;;  %v691_v4 = vld [vmem:[%s1030_s3] sm:$0xff] }
   0x3   :  { %13 = vsyncpa [#allocation3], 0  ;;  %186 = vmatpush.bf16.msra.mxu2 %v692_v1  ;;  %248 = vmatpush.bf16.msra.mxu3 %v692_v1  ;;  %v688_v5 = vld [vmem:[%s1029_s2 + $0x8] sm:$0xff]  ;;  %v687_v6 = vld [vmem:[%s1029_s2] sm:$0xff]  ;;  %vm73_vm0 = vcmask 523264   ;;  %s802_s16 = smov 64   ;;  %v91_v29 = vlaneseq }
   0x4   :  { %v693_v7 = vld [vmem:[%s1027_s0] sm:$0xff]  ;;  %s801_s0 = smov 32   ;;  %s803_s17 = smov 96   ;;  %v804_v32 = vmov 7   ;;  %vm604_vm3 = vcmask 123904   ;;  %vm125_vm4 = vcmask 261120  }
   0x5   :  { %v880_v9 = vld [vmem:[%s1031_s4] ss:$0 sm:$0xff]  ;;  %v894_v30 = vand.u32 127, %v91_v29  ;;  %v805_v61 = vmov 6   ;;  %vm613_vm9 = vcmask 255104   ;;  %vm622_vm12 = vcmask 254976  }
   0x6   :  { %82 = vmatpush.bf16.msra.mxu0 %v689_v2  ;;  %136 = vmatpush.bf16.msra.mxu1 %v691_v4  ;;  %v25_v26 = vld [vmem:[%s1028_s1] sm:$0x3]  ;;  %s811_s19 = smov [#allocation2]   ;;  %s631_s23 = sshll.u32 %s1032_s5, 4  ;;  %s632_s23 = int_to_ptr.hbm [resolvable:$true] %s631_s23 }
   0x7   :  { %187 = vmatpush.bf16.msra.mxu2 %v691_v4  ;;  %249 = vmatpush.bf16.msra.mxu3 %v691_v4  ;;  %vm93_vm1 = vcmp.lt.s32.totalorder %v894_v30, 16  ;;  %s629_s20 = sshll.u32 %s811_s19, 4  ;;  %s812_s25 = smov 2   ;;  %s630_s20 = int_to_ptr.vmem [resolvable:$true] %s629_s20 }
   0x8   :  { %v94_v33 = vsel %vm93_vm1, 0, %v804_v32  ;;  %v95_v62 = vsel %vm93_vm1, 1, %v805_v61  ;;  %v806_v32 = vmov 5  }
   0x9   :  { %137 = vmatmul.bf16.vlgmr.msra.gmra.mxu1 %v800_v3 }
   0xa   :  { %310 = vmatpush.bf16.msrb.mxu1 %v692_v1  ;;  %83 = vmatpush.bf16.msra.mxu0 %v688_v5 }
   0xb   :  { %372 = vmatpush.bf16.msrb.mxu2 %v692_v1  ;;  %428 = vmatpush.bf16.msrb.mxu3 %v692_v1 }
   0xe   :  { %311 = vmatpush.bf16.msrb.mxu1 %v691_v4  ;;  %84 = vmatpush.bf16.msra.mxu0 %v687_v6 }
   0xf   :  { %373 = vmatpush.bf16.msrb.mxu2 %v691_v4  ;;  %429 = vmatpush.bf16.msrb.mxu3 %v691_v4 }
  0x11   :  { %671 = vmatmul.msk.bf16.vlgmr.msra.gmra.mxu0 %vm73_vm0, %v693_v7 }
  0x12   :  { %552 = vmatpush.bf16.msra.mxu1 %v692_v1  ;;  %490 = vmatpush.bf16.msrb.mxu0 %v692_v1 }
  0x16   :  { %553 = vmatpush.bf16.msra.mxu1 %v691_v4  ;;  %491 = vmatpush.bf16.msrb.mxu0 %v691_v4 }
  0x86   :  { %v138_v8 = vpop.f32.mrf.mxu1 }
  0x8e   :  { %v86_v10 = vpop.f32.mrf.mxu0  ;;  %v140_v11 = vpop.f32.mrf.mxu1 }
  0x8f   :  { %v883_v12 = vadd.f32 %v880_v9, %v86_v10 }
  0x91   :  { %v142_v13 = vadd.f32 %v138_v8, %v883_v12 }
  0x93   :  { %710 = vtanh.f32 %v142_v13  ;;  %v143_v15 = vsub.f32 0.0, %v142_v13 }
  0x95   :  { %v144_v16 = vmul.f32 1.442695, %v143_v15 }
  0x97   :  { %712 = vpow2.f32 %v144_v16 }
  0x99   :  { %v711_v14 = vpop.eup %710 }
  0x9a   :  { %151 = vrot.lane.b32.xlu0 %v711_v14, %s801_s0 }
  0x9d   :  { %v713_v17 = vpop.eup %712 }
  0x9e   :  { %v146_v18 = vadd.f32 1.0, %v713_v17 }
  0xa0   :  { %714 = vrcp.f32 %v146_v18 }
  0xa6   :  { %v715_v19 = vpop.eup %714 }
  0xa7   :  { %v149_v22 = vmul.f32 0.0, %v715_v19 }
 0x10c   :  { %v152_v20 = vpop.permute.xlu0 %151 }
 0x10d   :  { %v154_v21 = vmul.f32 %v715_v19, %v152_v20 }
 0x10f   :  { %156 = vrot.lane.b32.xlu0 %v154_v21, %s801_s0 }
 0x181   :  { %v157_v23 = vpop.permute.xlu0 %156 }
 0x182   :  { %v159_v24 = vadd.f32 %v157_v23, %v149_v22 }
 0x184   :  { %716 = vtanh.f32 %v159_v24 }
 0x18a   :  { %v717_v25 = vpop.eup %716 }
 0x18b   :  { %162 = vrot.lane.b32.xlu1 %v717_v25, %s801_s0 }
 0x193   :  { %103 = vperm.xlu1 %707, %v25_v26  }
 0x1fd   :  { %v163_v27 = vpop.permute.xlu1 %162 }
 0x1fe   :  { %v165_v28 = vmul.f32 %v715_v19, %v163_v27 }
 0x200   :  { %167 = vrot.lane.b32.xlu2 %v165_v28, %s802_s16 }
 0x205   :  { %v897_v31 = vpop.permute.xlu1 %103 }
 0x206   :  { %vm105_vm2 = vcmp.gt.s32.totalorder %v897_v31, %v94_v33  ;;  %vm106_vm5 = vcmp.gt.s32.totalorder %v897_v31, %v95_v62  ;;  %v96_v33 = vsel %vm93_vm1, 2, %v806_v32  ;;  %v807_v62 = vmov 4  }
 0x207   :  { %vm107_vm6 = vcmp.gt.s32.totalorder %v897_v31, %v96_v33 }
 0x208   :  { %172 = vrot.lane.b32.xlu2 %v159_v24, %s803_s17 }
 0x25a   :  { %v168_v34 = vpop.permute.xlu2 %167 }
 0x25b   :  { %v902_v35 = vsel %vm105_vm2, %v168_v34, 0.0 }
 0x25c   :  { %605 = vst.msk [vmem:[#allocation2] sm:$0x3] %vm604_vm3, %v902_v35  ;;  %v176_v36 = vpack.c.bf16 %v902_v35, %v902_v35 }
 0x25e   :  { %680 = vmatmul.msk.bf16.vlgmr.msra.gmra.mxu2 %vm125_vm4, %v176_v36 }
 0x262   :  { %v173_v37 = vpop.permute.xlu2 %172 }
 0x263   :  { %v175_v38 = vsel %vm105_vm2, %v173_v37, 0.0 }
 0x264   :  { %v204_v39 = vrot.slane %v175_v38, 6 }
 0x266   :  { %205 = vrot.lane.b32.xlu1 %v204_v39, %s801_s0 }
 0x2d8   :  { %v206_v52 = vpop.permute.xlu1 %205 }
 0x2e1   :  { %v189_v40 = vpop.f32.mrf.mxu2 }
 0x2e2   :  { %v194_v41 = vrot.slane %v189_v40, 6 }
 0x2e4   :  { %v196_v42 = vadd.f32 %v194_v41, %v883_v12 }
 0x2e6   :  { %718 = vtanh.f32 %v196_v42  ;;  %v197_v45 = vsub.f32 0.0, %v196_v42 }
 0x2e8   :  { %v198_v46 = vmul.f32 1.442695, %v197_v45 }
 0x2e9   :  { %v191_v43 = vpop.f32.mrf.mxu2 }
 0x2ea   :  { %720 = vpow2.f32 %v198_v46 }
 0x2ec   :  { %v719_v44 = vpop.eup %718 }
 0x2ed   :  { %210 = vrot.lane.b32.xlu0 %v719_v44, %s801_s0 }
 0x2f0   :  { %v721_v47 = vpop.eup %720 }
 0x2f1   :  { %v200_v48 = vadd.f32 1.0, %v721_v47 }
 0x2f3   :  { %722 = vrcp.f32 %v200_v48 }
 0x2f9   :  { %v723_v49 = vpop.eup %722 }
 0x2fa   :  { %v208_v53 = vmul.f32 %v723_v49, %v206_v52 }
 0x35f   :  { %v211_v50 = vpop.permute.xlu0 %210 }
 0x360   :  { %v213_v51 = vmul.f32 %v723_v49, %v211_v50 }
 0x362   :  { %215 = vrot.lane.b32.xlu2 %v213_v51, %s801_s0 }
 0x3bc   :  { %v216_v54 = vpop.permute.xlu2 %215 }
 0x3bd   :  { %v218_v55 = vadd.f32 %v216_v54, %v208_v53 }
 0x3bf   :  { %724 = vtanh.f32 %v218_v55  ;;  %v233_v56 = vrot.slane %v218_v55, 2 }
 0x3c1   :  { %234 = vrot.lane.b32.xlu2 %v233_v56, %s803_s17 }
 0x3c5   :  { %v725_v57 = vpop.eup %724 }
 0x3c6   :  { %221 = vrot.lane.b32.xlu0 %v725_v57, %s801_s0 }
 0x41b   :  { %v235_v63 = vpop.permute.xlu2 %234 }
 0x41c   :  { %v237_v0 = vsel %vm106_vm5, %v235_v63, %v175_v38  ;;  %v97_v63 = vsel %vm93_vm1, 3, %v807_v62  ;;  %v809_v62 = vmov 2  }
 0x41d   :  { %v266_v1 = vrot.slane %v237_v0, 4  ;;  %vm108_vm7 = vcmp.gt.s32.totalorder %v897_v31, %v97_v63  ;;  %v99_v63 = vsel %vm93_vm1, 5, %v809_v62 }
 0x41e   :  { %vm110_vm10 = vcmp.gt.s32.totalorder %v897_v31, %v99_v63 }
 0x438   :  { %v222_v58 = vpop.permute.xlu0 %221 }
 0x439   :  { %v224_v59 = vmul.f32 %v723_v49, %v222_v58 }
 0x43b   :  { %v226_v60 = vrot.slane %v224_v59, 2 }
 0x43d   :  { %227 = vrot.lane.b32.xlu1 %v226_v60, %s802_s16 }
 0x445   :  { %267 = vrot.lane.b32.xlu1 %v266_v1, %s801_s0 }
 0x4af   :  { %v228_v2 = vpop.permute.xlu1 %227 }
 0x4b0   :  { %v920_v4 = vsel %vm106_vm5, %v228_v2, 0.0  ;;  %v231_v5 = vsel %vm106_vm5, %v228_v2, %v902_v35 }
 0x4b1   :  { %v238_v6 = vpack.c.bf16 %v231_v5, %v231_v5  ;;  %606 = vst.msk [vmem:[#allocation2 + $0x2] sm:$0x3] %vm604_vm3, %v920_v4 }
 0x4b3   :  { %681 = vmatmul.msk.bf16.vlgmr.msra.gmra.mxu3 %vm125_vm4, %v238_v6 }
 0x4b7   :  { %v268_v21 = vpop.permute.xlu1 %267 }
 0x536   :  { %v251_v7 = vpop.f32.mrf.mxu3 }
 0x537   :  { %v256_v8 = vrot.slane %v251_v7, 4 }
 0x539   :  { %v258_v10 = vadd.f32 %v256_v8, %v883_v12  ;;  %v88_v8 = vpop.f32.mrf.mxu0 }
 0x53b   :  { %726 = vtanh.f32 %v258_v10  ;;  %v259_v14 = vsub.f32 0.0, %v258_v10  ;;  %v954_v10 = vadd.f32 %v880_v9, %v88_v8 }
 0x53d   :  { %v260_v15 = vmul.f32 1.442695, %v259_v14 }
 0x53e   :  { %v253_v11 = vpop.f32.mrf.mxu3 }
 0x53f   :  { %728 = vpow2.f32 %v260_v15 }
 0x541   :  { %v727_v13 = vpop.eup %726 }
 0x542   :  { %272 = vrot.lane.b32.xlu0 %v727_v13, %s801_s0 }
 0x545   :  { %v729_v16 = vpop.eup %728 }
 0x546   :  { %v262_v17 = vadd.f32 1.0, %v729_v16 }
 0x548   :  { %730 = vrcp.f32 %v262_v17 }
 0x54e   :  { %v731_v18 = vpop.eup %730 }
 0x54f   :  { %v270_v22 = vmul.f32 %v731_v18, %v268_v21 }
 0x5b4   :  { %v273_v19 = vpop.permute.xlu0 %272 }
 0x5b5   :  { %v275_v20 = vmul.f32 %v731_v18, %v273_v19 }
 0x5b7   :  { %277 = vrot.lane.b32.xlu2 %v275_v20, %s801_s0 }
 0x611   :  { %v278_v23 = vpop.permute.xlu2 %277 }
 0x612   :  { %v280_v24 = vadd.f32 %v278_v23, %v270_v22 }
 0x614   :  { %732 = vtanh.f32 %v280_v24  ;;  %v295_v25 = vrot.slane %v280_v24, 4 }
 0x616   :  { %296 = vrot.lane.b32.xlu2 %v295_v25, %s803_s17 }
 0x61a   :  { %v733_v26 = vpop.eup %732 }
 0x61b   :  { %283 = vrot.lane.b32.xlu0 %v733_v26, %s801_s0 }
 0x670   :  { %v297_v34 = vpop.permute.xlu2 %296 }
 0x671   :  { %v299_v36 = vsel %vm107_vm6, %v297_v34, %v237_v0 }
 0x672   :  { %v328_v37 = vrot.slane %v299_v36, 2 }
 0x68d   :  { %v284_v27 = vpop.permute.xlu0 %283 }
 0x68e   :  { %v286_v28 = vmul.f32 %v731_v18, %v284_v27 }
 0x690   :  { %v288_v29 = vrot.slane %v286_v28, 4 }
 0x692   :  { %289 = vrot.lane.b32.xlu1 %v288_v29, %s802_s16  ;;  %v808_v29 = vmov 3  }
 0x693   :  { %v98_v32 = vsel %vm93_vm1, 4, %v808_v29 }
 0x694   :  { %vm109_vm8 = vcmp.gt.s32.totalorder %v897_v31, %v98_v32 }
 0x69a   :  { %329 = vrot.lane.b32.xlu1 %v328_v37, %s801_s0 }
 0x704   :  { %v290_v38 = vpop.permute.xlu1 %289 }
 0x705   :  { %v936_v39 = vsel %vm107_vm6, %v290_v38, 0.0  ;;  %v293_v40 = vsel %vm107_vm6, %v290_v38, %v231_v5 }
 0x706   :  { %v300_v41 = vpack.c.bf16 %v293_v40, %v293_v40  ;;  %607 = vst.msk [vmem:[#allocation2 + $0x4] sm:$0x3] %vm604_vm3, %v936_v39 }
 0x708   :  { %682 = vmatmul.msk.bf16.vlgmr.msrb.gmra.mxu1 %vm125_vm4, %v300_v41 }
 0x70c   :  { %v330_v54 = vpop.permute.xlu1 %329 }
 0x785   :  { %v313_v42 = vpop.f32.mrf.mxu1 }
 0x786   :  { %v318_v43 = vrot.slane %v313_v42, 2 }
 0x788   :  { %v320_v44 = vadd.f32 %v318_v43, %v883_v12 }
 0x78a   :  { %734 = vtanh.f32 %v320_v44  ;;  %v321_v47 = vsub.f32 0.0, %v320_v44 }
 0x78c   :  { %v322_v48 = vmul.f32 1.442695, %v321_v47 }
 0x78d   :  { %v315_v45 = vpop.f32.mrf.mxu1 }
 0x78e   :  { %736 = vpow2.f32 %v322_v48 }
 0x790   :  { %v735_v46 = vpop.eup %734 }
 0x791   :  { %334 = vrot.lane.b32.xlu0 %v735_v46, %s801_s0 }
 0x794   :  { %v737_v49 = vpop.eup %736 }
 0x795   :  { %v324_v50 = vadd.f32 1.0, %v737_v49 }
 0x797   :  { %738 = vrcp.f32 %v324_v50 }
 0x79d   :  { %v739_v51 = vpop.eup %738 }
 0x79e   :  { %v332_v55 = vmul.f32 %v739_v51, %v330_v54 }
 0x803   :  { %v335_v52 = vpop.permute.xlu0 %334 }
 0x804   :  { %v337_v53 = vmul.f32 %v739_v51, %v335_v52 }
 0x806   :  { %339 = vrot.lane.b32.xlu2 %v337_v53, %s801_s0 }
 0x860   :  { %v340_v56 = vpop.permute.xlu2 %339 }
 0x861   :  { %v342_v12 = vadd.f32 %v340_v56, %v332_v55 }
 0x863   :  { %740 = vtanh.f32 %v342_v12  ;;  %v357_v57 = vrot.slane %v342_v12, 6 }
 0x865   :  { %358 = vrot.lane.b32.xlu2 %v357_v57, %s803_s17 }
 0x869   :  { %v741_v58 = vpop.eup %740 }
 0x86a   :  { %345 = vrot.lane.b32.xlu0 %v741_v58, %s801_s0 }
 0x8bf   :  { %v359_v0 = vpop.permute.xlu2 %358 }
 0x8c0   :  { %v361_v1 = vsel %vm108_vm7, %v359_v0, %v299_v36 }
 0x8dc   :  { %v346_v59 = vpop.permute.xlu0 %345 }
 0x8dd   :  { %v348_v60 = vmul.f32 %v739_v51, %v346_v59 }
 0x8df   :  { %v350_v61 = vrot.slane %v348_v60, 6 }
 0x8e1   :  { %351 = vrot.lane.b32.xlu1 %v350_v61, %s802_s16 }
 0x8e9   :  { %387 = vrot.lane.b32.xlu1 %v361_v1, %s801_s0 }
 0x953   :  { %v352_v2 = vpop.permute.xlu1 %351 }
 0x954   :  { %v354_v5 = vsel %vm108_vm7, %v352_v2, 0.0  ;;  %v355_v6 = vsel %vm108_vm7, %v352_v2, %v293_v40 }
 0x955   :  { %v362_v7 = vpack.c.bf16 %v355_v6, %v355_v6  ;;  %608 = vst.msk [vmem:[#allocation2 + $0x6] sm:$0x3] %vm604_vm3, %v354_v5 }
 0x957   :  { %683 = vmatmul.msk.bf16.vlgmr.msrb.gmra.mxu2 %vm125_vm4, %v362_v7 }
 0x95b   :  { %v388_v9 = vpop.permute.xlu1 %387 }
 0x9da   :  { %v375_v11 = vpop.f32.mrf.mxu2 }
 0x9db   :  { %v379_v13 = vadd.f32 %v375_v11, %v954_v10 }
 0x9dd   :  { %742 = vtanh.f32 %v379_v13  ;;  %v380_v16 = vsub.f32 0.0, %v379_v13 }
 0x9df   :  { %v381_v17 = vmul.f32 1.442695, %v380_v16 }
 0x9e1   :  { %744 = vpow2.f32 %v381_v17 }
 0x9e2   :  { %v377_v14 = vpop.f32.mrf.mxu2 }
 0x9e3   :  { %v743_v15 = vpop.eup %742 }
 0x9e4   :  { %392 = vrot.lane.b32.xlu0 %v743_v15, %s801_s0 }
 0x9e7   :  { %v745_v18 = vpop.eup %744 }
 0x9e8   :  { %v383_v19 = vadd.f32 1.0, %v745_v18 }
 0x9ea   :  { %746 = vrcp.f32 %v383_v19 }
 0x9f0   :  { %v747_v20 = vpop.eup %746 }
 0x9f1   :  { %v390_v23 = vmul.f32 %v747_v20, %v388_v9 }
 0xa56   :  { %v393_v21 = vpop.permute.xlu0 %392 }
 0xa57   :  { %v395_v22 = vmul.f32 %v747_v20, %v393_v21 }
 0xa59   :  { %397 = vrot.lane.b32.xlu2 %v395_v22, %s801_s0 }
 0xab3   :  { %v398_v24 = vpop.permute.xlu2 %397 }
 0xab4   :  { %v400_v25 = vadd.f32 %v398_v24, %v390_v23 }
 0xab6   :  { %748 = vtanh.f32 %v400_v25  ;;  %414 = vrot.lane.b32.xlu2 %v400_v25, %s803_s17 }
 0xabc   :  { %v749_v26 = vpop.eup %748 }
 0xabd   :  { %403 = vrot.lane.b32.xlu0 %v749_v26, %s801_s0 }
 0xb10   :  { %v415_v33 = vpop.permute.xlu2 %414 }
 0xb11   :  { %v417_v34 = vsel %vm109_vm8, %v415_v33, %v361_v1  ;;  %v810_v33 = vmov 1  }
 0xb12   :  { %v446_v36 = vrot.slane %v417_v34, 6 }
 0xb2f   :  { %v404_v27 = vpop.permute.xlu0 %403 }
 0xb30   :  { %v406_v28 = vmul.f32 %v747_v20, %v404_v27 }
 0xb32   :  { %408 = vrot.lane.b32.xlu1 %v406_v28, %s802_s16 }
 0xb3a   :  { %447 = vrot.lane.b32.xlu1 %v446_v36, %s801_s0 }
 0xba4   :  { %v409_v37 = vpop.permute.xlu1 %408 }
 0xba5   :  { %v411_v38 = vsel %vm109_vm8, %v409_v37, 0.0  ;;  %v412_v40 = vsel %vm109_vm8, %v409_v37, %v355_v6 }
 0xba6   :  { %v418_v41 = vpack.c.bf16 %v412_v40, %v412_v40  ;;  %609 = vst.msk [vmem:[#allocation2 + $0x8] sm:$0x3] %vm604_vm3, %v411_v38 }
 0xba7   :  { %617 = vst.msk [vmem:[#allocation2 + $0x6] sm:$0x3] %vm613_vm9, %v411_v38 }
 0xba8   :  { %618 = vst.msk [vmem:[#allocation2 + $0x8] sm:$0x3] %vm613_vm9, %v354_v5  ;;  %684 = vmatmul.msk.bf16.vlgmr.msrb.gmra.mxu3 %vm125_vm4, %v418_v41 }
 0xbac   :  { %v448_v54 = vpop.permute.xlu1 %447 }
 0xc2b   :  { %v431_v42 = vpop.f32.mrf.mxu3 }
 0xc2c   :  { %v436_v43 = vrot.slane %v431_v42, 6 }
 0xc2e   :  { %v438_v44 = vadd.f32 %v436_v43, %v954_v10 }
 0xc30   :  { %750 = vtanh.f32 %v438_v44  ;;  %v439_v47 = vsub.f32 0.0, %v438_v44 }
 0xc32   :  { %v440_v48 = vmul.f32 1.442695, %v439_v47 }
 0xc33   :  { %v433_v45 = vpop.f32.mrf.mxu3 }
 0xc34   :  { %752 = vpow2.f32 %v440_v48 }
 0xc36   :  { %v751_v46 = vpop.eup %750 }
 0xc37   :  { %452 = vrot.lane.b32.xlu0 %v751_v46, %s801_s0 }
 0xc3a   :  { %v753_v49 = vpop.eup %752 }
 0xc3b   :  { %v442_v50 = vadd.f32 1.0, %v753_v49 }
 0xc3d   :  { %754 = vrcp.f32 %v442_v50 }
 0xc43   :  { %v755_v51 = vpop.eup %754 }
 0xc44   :  { %v450_v55 = vmul.f32 %v755_v51, %v448_v54 }
 0xca9   :  { %v453_v52 = vpop.permute.xlu0 %452 }
 0xcaa   :  { %v455_v53 = vmul.f32 %v755_v51, %v453_v52 }
 0xcac   :  { %457 = vrot.lane.b32.xlu2 %v455_v53, %s801_s0 }
 0xd06   :  { %v458_v56 = vpop.permute.xlu2 %457 }
 0xd07   :  { %v460_v12 = vadd.f32 %v458_v56, %v450_v55 }
 0xd09   :  { %756 = vtanh.f32 %v460_v12  ;;  %v475_v57 = vrot.slane %v460_v12, 2 }
 0xd0b   :  { %476 = vrot.lane.b32.xlu2 %v475_v57, %s803_s17 }
 0xd0f   :  { %v757_v58 = vpop.eup %756 }
 0xd10   :  { %463 = vrot.lane.b32.xlu0 %v757_v58, %s801_s0 }
 0xd65   :  { %v477_v0 = vpop.permute.xlu2 %476 }
 0xd66   :  { %v479_v1 = vsel %vm110_vm10, %v477_v0, %v417_v34  ;;  %v100_v34 = vsel %vm93_vm1, 6, %v810_v33 }
 0xd67   :  { %v508_v2 = vrot.slane %v479_v1, 4  ;;  %vm111_vm11 = vcmp.gt.s32.totalorder %v897_v31, %v100_v34 }
 0xd82   :  { %v464_v59 = vpop.permute.xlu0 %463 }
 0xd83   :  { %v466_v60 = vmul.f32 %v755_v51, %v464_v59  ;;  %v101_v59 = vsel %vm93_vm1, 7, %v800_v3 }
 0xd84   :  { %vm112_vm13 = vcmp.gt.s32.totalorder %v897_v31, %v101_v59 }
 0xd85   :  { %v468_v61 = vrot.slane %v466_v60, 2 }
 0xd87   :  { %469 = vrot.lane.b32.xlu1 %v468_v61, %s802_s16 }
 0xd8f   :  { %509 = vrot.lane.b32.xlu1 %v508_v2, %s801_s0 }
 0xdf9   :  { %v470_v5 = vpop.permute.xlu1 %469 }
 0xdfa   :  { %v472_v6 = vsel %vm110_vm10, %v470_v5, 0.0  ;;  %v473_v7 = vsel %vm110_vm10, %v470_v5, %v412_v40 }
 0xdfb   :  { %v480_v8 = vpack.c.bf16 %v473_v7, %v473_v7  ;;  %610 = vst.msk [vmem:[#allocation2 + $0xa] sm:$0x3] %vm604_vm3, %v472_v6 }
 0xdfc   :  { %616 = vst.msk [vmem:[#allocation2 + $0x4] sm:$0x3] %vm613_vm9, %v472_v6 }
 0xdfd   :  { %619 = vst.msk [vmem:[#allocation2 + $0xa] sm:$0x3] %vm613_vm9, %v936_v39  ;;  %685 = vmatmul.msk.bf16.vlgmr.msrb.gmra.mxu0 %vm125_vm4, %v480_v8 }
 0xe01   :  { %v510_v9 = vpop.permute.xlu1 %509 }
 0xe7a   :  { %v493_v11 = vpop.f32.mrf.mxu0 }
 0xe7b   :  { %v498_v13 = vrot.slane %v493_v11, 4 }
 0xe7d   :  { %v500_v14 = vadd.f32 %v498_v13, %v954_v10 }
 0xe7f   :  { %758 = vtanh.f32 %v500_v14  ;;  %v501_v17 = vsub.f32 0.0, %v500_v14 }
 0xe81   :  { %v502_v18 = vmul.f32 1.442695, %v501_v17 }
 0xe82   :  { %v495_v15 = vpop.f32.mrf.mxu0 }
 0xe83   :  { %760 = vpow2.f32 %v502_v18 }
 0xe85   :  { %v759_v16 = vpop.eup %758 }
 0xe86   :  { %514 = vrot.lane.b32.xlu0 %v759_v16, %s801_s0 }
 0xe89   :  { %v761_v19 = vpop.eup %760 }
 0xe8a   :  { %v504_v20 = vadd.f32 1.0, %v761_v19 }
 0xe8c   :  { %762 = vrcp.f32 %v504_v20 }
 0xe92   :  { %v763_v21 = vpop.eup %762 }
 0xe93   :  { %v512_v23 = vmul.f32 %v763_v21, %v510_v9 }
 0xef8   :  { %v515_v22 = vpop.permute.xlu0 %514 }
 0xef9   :  { %v517_v39 = vmul.f32 %v763_v21, %v515_v22 }
 0xefb   :  { %519 = vrot.lane.b32.xlu2 %v517_v39, %s801_s0 }
 0xf55   :  { %v520_v24 = vpop.permute.xlu2 %519 }
 0xf56   :  { %v522_v25 = vadd.f32 %v520_v24, %v512_v23 }
 0xf58   :  { %764 = vtanh.f32 %v522_v25  ;;  %v537_v26 = vrot.slane %v522_v25, 4 }
 0xf5a   :  { %538 = vrot.lane.b32.xlu2 %v537_v26, %s803_s17 }
 0xf5e   :  { %v765_v27 = vpop.eup %764 }
 0xf5f   :  { %525 = vrot.lane.b32.xlu0 %v765_v27, %s801_s0 }
 0xfb4   :  { %v539_v36 = vpop.permute.xlu2 %538 }
 0xfb5   :  { %v541_v37 = vsel %vm111_vm11, %v539_v36, %v479_v1 }
 0xfb6   :  { %v570_v38 = vrot.slane %v541_v37, 2 }
 0xfd1   :  { %v526_v28 = vpop.permute.xlu0 %525 }
 0xfd2   :  { %v528_v29 = vmul.f32 %v763_v21, %v526_v28 }
 0xfd4   :  { %v530_v32 = vrot.slane %v528_v29, 4 }
 0xfd6   :  { %531 = vrot.lane.b32.xlu1 %v530_v32, %s802_s16 }
 0xfde   :  { %571 = vrot.lane.b32.xlu1 %v570_v38, %s801_s0 }
0x1048   :  { %v532_v40 = vpop.permute.xlu1 %531 }
0x1049   :  { %v534_v41 = vsel %vm111_vm11, %v532_v40, 0.0  ;;  %v535_v42 = vsel %vm111_vm11, %v532_v40, %v473_v7 }
0x104a   :  { %v542_v43 = vpack.c.bf16 %v535_v42, %v535_v42  ;;  %611 = vst.msk [vmem:[#allocation2 + $0xc] sm:$0x3] %vm604_vm3, %v534_v41 }
0x104b   :  { %615 = vst.msk [vmem:[#allocation2 + $0x2] sm:$0x3] %vm613_vm9, %v534_v41 }
0x104c   :  { %620 = vst.msk [vmem:[#allocation2 + $0xc] sm:$0x3] %vm613_vm9, %v920_v4  ;;  %686 = vmatmul.msk.bf16.vlgmr.msra.gmra.mxu1 %vm125_vm4, %v542_v43 }
0x1050   :  { %v572_v55 = vpop.permute.xlu1 %571 }
0x10c9   :  { %v555_v44 = vpop.f32.mrf.mxu1 }
0x10ca   :  { %v560_v45 = vrot.slane %v555_v44, 2 }
0x10cc   :  { %v562_v46 = vadd.f32 %v560_v45, %v954_v10 }
0x10ce   :  { %766 = vtanh.f32 %v562_v46  ;;  %v563_v49 = vsub.f32 0.0, %v562_v46 }
0x10d0   :  { %v564_v50 = vmul.f32 1.442695, %v563_v49 }
0x10d1   :  { %v557_v47 = vpop.f32.mrf.mxu1 }
0x10d2   :  { %768 = vpow2.f32 %v564_v50 }
0x10d4   :  { %v767_v48 = vpop.eup %766 }
0x10d5   :  { %576 = vrot.lane.b32.xlu0 %v767_v48, %s801_s0 }
0x10d8   :  { %v769_v51 = vpop.eup %768 }
0x10d9   :  { %v566_v52 = vadd.f32 1.0, %v769_v51 }
0x10db   :  { %770 = vrcp.f32 %v566_v52 }
0x10e1   :  { %v771_v53 = vpop.eup %770 }
0x10e2   :  { %v574_v56 = vmul.f32 %v771_v53, %v572_v55 }
0x1147   :  { %v577_v54 = vpop.permute.xlu0 %576 }
0x1148   :  { %v579_v4 = vmul.f32 %v771_v53, %v577_v54 }
0x114a   :  { %581 = vrot.lane.b32.xlu2 %v579_v4, %s801_s0 }
0x11a4   :  { %v582_v12 = vpop.permute.xlu2 %581 }
0x11a5   :  { %v584_v10 = vadd.f32 %v582_v12, %v574_v56 }
0x11a7   :  { %772 = vtanh.f32 %v584_v10  ;;  %v599_v57 = vrot.slane %v584_v10, 6 }
0x11a9   :  { %600 = vrot.lane.b32.xlu2 %v599_v57, %s803_s17 }
0x11ad   :  { %v773_v58 = vpop.eup %772 }
0x11ae   :  { %587 = vrot.lane.b32.xlu0 %v773_v58, %s801_s0 }
0x1203   :  { %v601_v60 = vpop.permute.xlu2 %600 }
0x1204   :  { %v603_v61 = vsel %vm112_vm13, %v601_v60, %v541_v37 }
0x1205   :  { %624 = vst.msk [vmem:[%s1034_s7] sm:$0x3] %vm622_vm12, %v603_v61 }
0x1220   :  { %v588_v62 = vpop.permute.xlu0 %587 }
0x1221   :  { %v590_v63 = vmul.f32 %v771_v53, %v588_v62 }
0x1223   :  { %v592_v0 = vrot.slane %v590_v63, 6 }
0x1225   :  { %593 = vrot.lane.b32.xlu1 %v592_v0, %s802_s16 }
0x1297   :  { %v594_v1 = vpop.permute.xlu1 %593 }
0x1298   :  { %v596_v3 = vsel %vm112_vm13, %v594_v1, 0.0  ;;  %v597_v30 = vsel %vm112_vm13, %v594_v1, %v535_v42 }
0x1299   :  { %612 = vst.msk [vmem:[#allocation2 + $0xe] sm:$0x3] %vm604_vm3, %v596_v3 }
0x129a   :  { %614 = vst.msk [vmem:[#allocation2] sm:$0x3] %vm613_vm9, %v596_v3 }
0x129b   :  { %621 = vst.msk [vmem:[#allocation2 + $0xe] sm:$0x3] %vm613_vm9, %v902_v35 }
0x129c   :  { %623 = vst.msk [vmem:[%s1033_s6] sm:$0x3] %vm622_vm12, %v597_v30 }
0x129d   :  { %637 = dma.vmem_to_hbm [thread:$0]  %s630_s20, 256, %s632_s23, [#allocation3], %s801_s0, %s801_s0, %s812_s25  }
0x129e   :  { %798 = dma.done.wait [#allocation3], 256  }
0x129f   :  { %799 = vsyncadd [#allocation3], 4294967040 }
0x12a0   :  { %650 = vsyncpa [#allocation3], 1 }

</bundles_post_ra>
